<compile_context>
chip_gen: v7x
topology: tpu7x:2x2x1
jax: 0.10.0
libtpu: 0.0.40
codegen_flags: <defaults>
</compile_context>

<pallas_src>
from functools import partial

import jax
import jax.numpy as jnp
from jax import lax
from jax.experimental import pallas as pl
from jax.experimental.pallas import tpu as pltpu

GROUPS = 8
EPS = 1e-5


def _upsampling2d_kernel(x_ref, rt_ref, mask_ref,
                         g1_ref, b1_ref, gm1_ref, w1_ref,
                         g2_ref, b2_ref, gm2_ref, w2_ref,
                         o_ref, *, W):
    """Fused upsample + (GN -> 3x3 conv -> ReLU) x2 for one batch element.

    Channel-major layout: channels on sublanes, flattened spatial on lanes.
      x_ref   : (1, Cin, Hs*Ws)  small (pre-upsample) input
      rt_ref  : (Hs*Ws, H*W)     nearest-upsample replication matrix (0/1)
      mask_ref: (9, H*W)         per-tap zero-padding validity masks
      g*,b*   : (C, 1)           GroupNorm affine params
      gm*     : (C, C)           group-averaging matrix, 1/(count*cg) in-group
      w*      : (Cout, 9*C)      conv taps (bf16), column index = k*C + c
      o_ref   : (1, Cout, H*W)
    """
    P = rt_ref.shape[1]          # H * W (lane axis)
    masks = mask_ref[...]        # (9, P) f32

    def group_norm(x2d, gm_ref, g_ref, b_ref):
        # x2d: (C, P') f32.  Group mean / E[x^2] via the group-averaging matmul.
        gm = gm_ref[...]
        mean = jnp.sum(jnp.dot(gm, x2d, preferred_element_type=jnp.float32),
                       axis=1, keepdims=True)                      # (C, 1)
        ex2 = jnp.sum(jnp.dot(gm, x2d * x2d, preferred_element_type=jnp.float32),
                      axis=1, keepdims=True)                       # (C, 1)
        var = jnp.maximum(ex2 - mean * mean, 0.0)                  # no NaN from cancellation
        inv = lax.rsqrt(var + EPS)
        return (x2d - mean) * inv * g_ref[...] + b_ref[...]

    def conv3x3_relu(x2d, w_ref):
        # x2d: (C, P) f32 -> ReLU(3x3 SAME conv) as (Cout, P) f32.
        # Taps via lane rotation + boundary mask (= zero padding); one MXU matmul.
        taps = []
        k = 0
        for dy in (-1, 0, 1):
            for dx in (-1, 0, 1):
                s = dy * W + dx
                t = x2d if s == 0 else pltpu.roll(x2d, shift=(-s) % P, axis=1)
                taps.append(t * masks[k:k + 1, :])
                k += 1
        patches = jnp.concatenate(taps, axis=0).astype(jnp.bfloat16)   # (9C, P)
        y = jnp.dot(w_ref[...], patches, preferred_element_type=jnp.float32)
        return jnp.maximum(y, 0.0)

    xs = x_ref[0].astype(jnp.float32)                    # (Cin, Hs*Ws)

    # GroupNorm-1 on the small tensor (stats are invariant under 2x nearest
    # upsample), then upsample the normalized tensor with one replication matmul.
    xn = group_norm(xs, gm1_ref, g1_ref, b1_ref)                        # (Cin, Hs*Ws)
    up = jnp.dot(xn, rt_ref[...], preferred_element_type=jnp.float32)   # (Cin, P)

    y1 = conv3x3_relu(up, w1_ref)                                       # (Cout, P)
    y2 = conv3x3_relu(group_norm(y1, gm2_ref, g2_ref, b2_ref), w2_ref)  # (Cout, P)

    o_ref[0] = y2.astype(o_ref.dtype)


def _group_avg_matrix(C, spatial_count):
    cg = C // GROUPS
    grp = jnp.arange(C) // cg
    same = (grp[:, None] == grp[None, :]).astype(jnp.float32)
    return same / float(spatial_count * cg)              # (C, C)


def _conv_weight_flat(w_oihw):
    # (Cout, Cin, 3, 3) -> (Cout, 9*Cin), column index = (ky*3+kx)*Cin + c
    Co, Ci = w_oihw.shape[0], w_oihw.shape[1]
    return jnp.transpose(w_oihw, (0, 2, 3, 1)).reshape(Co, 9 * Ci).astype(jnp.bfloat16)


def upsampling_2d_forward(x_nchw, params, encoder_features=None):
    """Upsampling_2d.forward. Input/output layout: NCHW (PyTorch convention)."""
    if encoder_features is not None:
        # TODO(synk): encoder-feature channel-concat path is not fused into the kernel.
        raise NotImplementedError("encoder_features path not implemented")

    N, Cin, Hs, Ws = x_nchw.shape
    H, W = 2 * Hs, 2 * Ws
    Cout = params["w1"].shape[0]
    assert Cin % GROUPS == 0 and Cout % GROUPS == 0, "GroupNorm(8) needs C % 8 == 0"
    Ps, P = Hs * Ws, H * W

    x_flat = x_nchw.reshape(N, Cin, Ps).astype(jnp.float32)   # NCHW, spatial flattened

    # 2x nearest-neighbour replication matrix: R[p_small, q] = 1 iff output pixel
    # q = (h, w) maps to small pixel (h//2, w//2) = p_small.
    p_small_of_q = ((jnp.arange(H)[:, None] // 2) * Ws
                    + (jnp.arange(W)[None, :] // 2)).reshape(P)
    r_t = (jnp.arange(Ps)[:, None] == p_small_of_q[None, :]).astype(jnp.float32)

    # Per-tap validity masks (implement the conv's zero padding), k = (dy+1)*3+(dx+1).
    hh = jnp.arange(P) // W
    ww = jnp.arange(P) % W
    masks = jnp.stack(
        [((hh + dy >= 0) & (hh + dy < H) & (ww + dx >= 0) & (ww + dx < W))
         for dy in (-1, 0, 1) for dx in (-1, 0, 1)], axis=0).astype(jnp.float32)

    gm1 = _group_avg_matrix(Cin, Ps)    # block-1 stats are computed on the SMALL tensor
    gm2 = _group_avg_matrix(Cout, P)
    w1 = _conv_weight_flat(params["w1"])
    w2 = _conv_weight_flat(params["w2"])
    g1 = params["g1"].reshape(Cin, 1).astype(jnp.float32)
    b1 = params["b1"].reshape(Cin, 1).astype(jnp.float32)
    g2 = params["g2"].reshape(Cout, 1).astype(jnp.float32)
    b2 = params["b2"].reshape(Cout, 1).astype(jnp.float32)

    def full_spec(shape):
        zeros = (0,) * len(shape)
        return pl.BlockSpec(shape, lambda n, _z=zeros: _z)

    out = pl.pallas_call(
        partial(_upsampling2d_kernel, W=W),
        out_shape=jax.ShapeDtypeStruct((N, Cout, P), jnp.float32),
        grid=(N,),
        in_specs=[
            pl.BlockSpec((1, Cin, Ps), lambda n: (n, 0, 0)),
            full_spec((Ps, P)),
            full_spec((9, P)),
            full_spec((Cin, 1)),
            full_spec((Cin, 1)),
            full_spec((Cin, Cin)),
            full_spec((Cout, 9 * Cin)),
            full_spec((Cout, 1)),
            full_spec((Cout, 1)),
            full_spec((Cout, Cout)),
            full_spec((Cout, 9 * Cout)),
        ],
        out_specs=pl.BlockSpec((1, Cout, P), lambda n: (n, 0, 0)),
        compiler_params=pltpu.CompilerParams(
            dimension_semantics=("parallel",)),
    )(x_flat, r_t, masks, g1, b1, gm1, w1, g2, b2, gm2, w2)

    # (N, Cout, H*W) -> NCHW: pure metadata reshape, no transpose needed.
    return out.reshape(N, Cout, H, W)


# ------------------------------ pure-JAX reference ------------------------------
def _ref_block(x, gamma, beta, w):
    N, C, H, W = x.shape
    xg = x.reshape(N, GROUPS, C // GROUPS, H, W)
    mean = xg.mean(axis=(2, 3, 4), keepdims=True)
    var = ((xg - mean) ** 2).mean(axis=(2, 3, 4), keepdims=True)
    xn = ((xg - mean) * lax.rsqrt(var + EPS)).reshape(N, C, H, W)
    xn = xn * gamma[None, :, None, None] + beta[None, :, None, None]
    y = lax.conv_general_dilated(xn, w, (1, 1), "SAME",
                                 dimension_numbers=("NCHW", "OIHW", "NCHW"))
    return jnp.maximum(y, 0.0)


def upsampling_2d_reference(x_nchw, params):
    x = jnp.repeat(jnp.repeat(x_nchw, 2, axis=2), 2, axis=3)
    x = _ref_block(x, params["g1"], params["b1"], params["w1"])
    x = _ref_block(x, params["g2"], params["b2"], params["w2"])
    return x


if __name__ == "__main__":
    key = jax.random.PRNGKey(0)
    k_x, k_w1, k_w2, k_g1, k_b1, k_g2, k_b2 = jax.random.split(key, 7)

    N, Cin, Cout, Hs, Ws = 2, 8, 16, 8, 8   # upsampled to 16x16 inside forward
    x = jax.random.normal(k_x, (N, Cin, Hs, Ws), jnp.float32)

    params = {
        "w1": 0.1 * jax.random.normal(k_w1, (Cout, Cin, 3, 3), jnp.float32),
        "g1": 1.0 + 0.1 * jax.random.normal(k_g1, (Cin,), jnp.float32),
        "b1": 0.1 * jax.random.normal(k_b1, (Cin,), jnp.float32),
        "w2": 0.1 * jax.random.normal(k_w2, (Cout, Cout, 3, 3), jnp.float32),
        "g2": 1.0 + 0.1 * jax.random.normal(k_g2, (Cout,), jnp.float32),
        "b2": 0.1 * jax.random.normal(k_b2, (Cout,), jnp.float32),
    }

    out = jax.jit(partial(upsampling_2d_forward, params=params))(x)
    out = jax.block_until_ready(out)

    ref = jax.block_until_ready(upsampling_2d_reference(x, params))
    assert out.shape == (N, Cout, 2 * Hs, 2 * Ws), out.shape
    assert jnp.all(jnp.isfinite(out))
    assert jnp.allclose(out, ref, rtol=5e-2, atol=5e-2), float(jnp.abs(out - ref).max())

    print("KERNEL_OK")
</pallas_src>

<mosaic_0001>
module attributes {stable_mosaic.version = 11 : i64} {
  func.func @_upsampling2d_kernel(%arg0: i32, %arg1: memref<1x8x64xf32, #tpu.memory_space<vmem>>, %arg2: memref<64x256xf32, #tpu.memory_space<vmem>>, %arg3: memref<9x256xf32, #tpu.memory_space<vmem>>, %arg4: memref<8x1xf32, #tpu.memory_space<vmem>>, %arg5: memref<8x1xf32, #tpu.memory_space<vmem>>, %arg6: memref<8x8xf32, #tpu.memory_space<vmem>>, %arg7: memref<16x72xbf16, #tpu.memory_space<vmem>>, %arg8: memref<16x1xf32, #tpu.memory_space<vmem>>, %arg9: memref<16x1xf32, #tpu.memory_space<vmem>>, %arg10: memref<16x16xf32, #tpu.memory_space<vmem>>, %arg11: memref<16x144xbf16, #tpu.memory_space<vmem>>, %arg12: memref<1x16x256xf32, #tpu.memory_space<vmem>>) attributes {dimension_semantics = [#tpu.dimension_semantics<parallel>], iteration_bounds = array<i64: 2>, scalar_prefetch = 0 : i64, scratch_operands = 0 : i64, tpu.core_type = #tpu.core_type<tc>, window_params = [{transform_indices = @transform_0, window_bounds = array<i64: 1, 8, 64>}, {pipeline_mode = #tpu.pipeline_mode<synchronous>, transform_indices = @transform_1, window_bounds = array<i64: 64, 256>}, {pipeline_mode = #tpu.pipeline_mode<synchronous>, transform_indices = @transform_2, window_bounds = array<i64: 9, 256>}, {pipeline_mode = #tpu.pipeline_mode<synchronous>, transform_indices = @transform_3, window_bounds = array<i64: 8, 1>}, {pipeline_mode = #tpu.pipeline_mode<synchronous>, transform_indices = @transform_4, window_bounds = array<i64: 8, 1>}, {pipeline_mode = #tpu.pipeline_mode<synchronous>, transform_indices = @transform_5, window_bounds = array<i64: 8, 8>}, {pipeline_mode = #tpu.pipeline_mode<synchronous>, transform_indices = @transform_6, window_bounds = array<i64: 16, 72>}, {pipeline_mode = #tpu.pipeline_mode<synchronous>, transform_indices = @transform_7, window_bounds = array<i64: 16, 1>}, {pipeline_mode = #tpu.pipeline_mode<synchronous>, transform_indices = @transform_8, window_bounds = array<i64: 16, 1>}, {pipeline_mode = #tpu.pipeline_mode<synchronous>, transform_indices = @transform_9, window_bounds = array<i64: 16, 16>}, {pipeline_mode = #tpu.pipeline_mode<synchronous>, transform_indices = @transform_10, window_bounds = array<i64: 16, 144>}, {transform_indices = @transform_11, window_bounds = array<i64: 1, 16, 256>}]} {
    %c0 = arith.constant 0 : index
    %c0_0 = arith.constant 0 : index
    %0 = vector.load %arg3[%c0, %c0_0] : memref<9x256xf32, #tpu.memory_space<vmem>>, vector<9x256xf32>
    %c0_1 = arith.constant 0 : index
    %c0_2 = arith.constant 0 : index
    %c0_3 = arith.constant 0 : index
    %1 = vector.load %arg1[%c0_1, %c0_2, %c0_3] : memref<1x8x64xf32, #tpu.memory_space<vmem>>, vector<1x8x64xf32>
    %2 = vector.shape_cast %1 : vector<1x8x64xf32> to vector<8x64xf32>
    %c0_4 = arith.constant 0 : index
    %c0_5 = arith.constant 0 : index
    %3 = vector.load %arg6[%c0_4, %c0_5] : memref<8x8xf32, #tpu.memory_space<vmem>>, vector<8x8xf32>
    %cst = arith.constant dense<0.000000e+00> : vector<8x64xf32>
    %4 = tpu.matmul %3, %2, %cst {dimension_numbers = #tpu.dot_dimension_numbers<[1], [0], [0], [1], [0, 0, 1, 1], [], []>} : vector<8x8xf32>, vector<8x64xf32>, vector<8x64xf32> -> vector<8x64xf32>
    %cst_6 = arith.constant dense<0.000000e+00> : vector<8xf32>
    %5 = vector.multi_reduction <add>, %4, %cst_6 [1] : vector<8x64xf32> to vector<8xf32>
    %6 = vector.shape_cast %5 : vector<8xf32> to vector<8x1xf32>
    %7 = arith.mulf %2, %2 : vector<8x64xf32>
    %cst_7 = arith.constant dense<0.000000e+00> : vector<8x64xf32>
    %8 = tpu.matmul %3, %7, %cst_7 {dimension_numbers = #tpu.dot_dimension_numbers<[1], [0], [0], [1], [0, 0, 1, 1], [], []>} : vector<8x8xf32>, vector<8x64xf32>, vector<8x64xf32> -> vector<8x64xf32>
    %cst_8 = arith.constant dense<0.000000e+00> : vector<8xf32>
    %9 = vector.multi_reduction <add>, %8, %cst_8 [1] : vector<8x64xf32> to vector<8xf32>
    %10 = vector.shape_cast %9 : vector<8xf32> to vector<8x1xf32>
    %11 = arith.mulf %6, %6 : vector<8x1xf32>
    %12 = arith.subf %10, %11 : vector<8x1xf32>
    %cst_9 = arith.constant 0.000000e+00 : f32
    %13 = vector.broadcast %cst_9 : f32 to vector<8x1xf32>
    %14 = arith.maximumf %12, %13 : vector<8x1xf32>
    %cst_10 = arith.constant 9.99999974E-6 : f32
    %15 = vector.broadcast %cst_10 : f32 to vector<8x1xf32>
    %16 = arith.addf %14, %15 : vector<8x1xf32>
    %17 = math.rsqrt %16 : vector<8x1xf32>
    %18 = vector.broadcast %6 : vector<8x1xf32> to vector<8x64xf32>
    %19 = arith.subf %2, %18 : vector<8x64xf32>
    %20 = vector.broadcast %17 : vector<8x1xf32> to vector<8x64xf32>
    %21 = arith.mulf %19, %20 : vector<8x64xf32>
    %c0_11 = arith.constant 0 : index
    %c0_12 = arith.constant 0 : index
    %22 = vector.load %arg4[%c0_11, %c0_12] : memref<8x1xf32, #tpu.memory_space<vmem>>, vector<8x1xf32>
    %23 = vector.broadcast %22 : vector<8x1xf32> to vector<8x64xf32>
    %24 = arith.mulf %21, %23 : vector<8x64xf32>
    %c0_13 = arith.constant 0 : index
    %c0_14 = arith.constant 0 : index
    %25 = vector.load %arg5[%c0_13, %c0_14] : memref<8x1xf32, #tpu.memory_space<vmem>>, vector<8x1xf32>
    %26 = vector.broadcast %25 : vector<8x1xf32> to vector<8x64xf32>
    %27 = arith.addf %24, %26 : vector<8x64xf32>
    %c0_15 = arith.constant 0 : index
    %c0_16 = arith.constant 0 : index
    %28 = vector.load %arg2[%c0_15, %c0_16] : memref<64x256xf32, #tpu.memory_space<vmem>>, vector<64x256xf32>
    %cst_17 = arith.constant dense<0.000000e+00> : vector<8x256xf32>
    %29 = tpu.matmul %27, %28, %cst_17 {dimension_numbers = #tpu.dot_dimension_numbers<[1], [0], [0], [1], [0, 0, 1, 1], [], []>} : vector<8x64xf32>, vector<64x256xf32>, vector<8x256xf32> -> vector<8x256xf32>
    %c17_i32 = arith.constant 17 : i32
    %30 = tpu.dynamic_rotate %29 by %c17_i32 dim 1 : vector<8x256xf32>, i32 -> vector<8x256xf32>
    %31 = vector.extract_strided_slice %0 {offsets = [0, 0], sizes = [1, 256], strides = [1, 1]} : vector<9x256xf32> to vector<1x256xf32>
    %32 = vector.broadcast %31 : vector<1x256xf32> to vector<8x256xf32>
    %33 = arith.mulf %30, %32 : vector<8x256xf32>
    %c16_i32 = arith.constant 16 : i32
    %34 = tpu.dynamic_rotate %29 by %c16_i32 dim 1 : vector<8x256xf32>, i32 -> vector<8x256xf32>
    %35 = vector.extract_strided_slice %0 {offsets = [1, 0], sizes = [1, 256], strides = [1, 1]} : vector<9x256xf32> to vector<1x256xf32>
    %36 = vector.broadcast %35 : vector<1x256xf32> to vector<8x256xf32>
    %37 = arith.mulf %34, %36 : vector<8x256xf32>
    %c15_i32 = arith.constant 15 : i32
    %38 = tpu.dynamic_rotate %29 by %c15_i32 dim 1 : vector<8x256xf32>, i32 -> vector<8x256xf32>
    %39 = vector.extract_strided_slice %0 {offsets = [2, 0], sizes = [1, 256], strides = [1, 1]} : vector<9x256xf32> to vector<1x256xf32>
    %40 = vector.broadcast %39 : vector<1x256xf32> to vector<8x256xf32>
    %41 = arith.mulf %38, %40 : vector<8x256xf32>
    %c1_i32 = arith.constant 1 : i32
    %42 = tpu.dynamic_rotate %29 by %c1_i32 dim 1 : vector<8x256xf32>, i32 -> vector<8x256xf32>
    %43 = vector.extract_strided_slice %0 {offsets = [3, 0], sizes = [1, 256], strides = [1, 1]} : vector<9x256xf32> to vector<1x256xf32>
    %44 = vector.broadcast %43 : vector<1x256xf32> to vector<8x256xf32>
    %45 = arith.mulf %42, %44 : vector<8x256xf32>
    %46 = vector.extract_strided_slice %0 {offsets = [4, 0], sizes = [1, 256], strides = [1, 1]} : vector<9x256xf32> to vector<1x256xf32>
    %47 = vector.broadcast %46 : vector<1x256xf32> to vector<8x256xf32>
    %48 = arith.mulf %29, %47 : vector<8x256xf32>
    %c255_i32 = arith.constant 255 : i32
    %49 = tpu.dynamic_rotate %29 by %c255_i32 dim 1 : vector<8x256xf32>, i32 -> vector<8x256xf32>
    %50 = vector.extract_strided_slice %0 {offsets = [5, 0], sizes = [1, 256], strides = [1, 1]} : vector<9x256xf32> to vector<1x256xf32>
    %51 = vector.broadcast %50 : vector<1x256xf32> to vector<8x256xf32>
    %52 = arith.mulf %49, %51 : vector<8x256xf32>
    %c241_i32 = arith.constant 241 : i32
    %53 = tpu.dynamic_rotate %29 by %c241_i32 dim 1 : vector<8x256xf32>, i32 -> vector<8x256xf32>
    %54 = vector.extract_strided_slice %0 {offsets = [6, 0], sizes = [1, 256], strides = [1, 1]} : vector<9x256xf32> to vector<1x256xf32>
    %55 = vector.broadcast %54 : vector<1x256xf32> to vector<8x256xf32>
    %56 = arith.mulf %53, %55 : vector<8x256xf32>
    %c240_i32 = arith.constant 240 : i32
    %57 = tpu.dynamic_rotate %29 by %c240_i32 dim 1 : vector<8x256xf32>, i32 -> vector<8x256xf32>
    %58 = vector.extract_strided_slice %0 {offsets = [7, 0], sizes = [1, 256], strides = [1, 1]} : vector<9x256xf32> to vector<1x256xf32>
    %59 = vector.broadcast %58 : vector<1x256xf32> to vector<8x256xf32>
    %60 = arith.mulf %57, %59 : vector<8x256xf32>
    %c239_i32 = arith.constant 239 : i32
    %61 = tpu.dynamic_rotate %29 by %c239_i32 dim 1 : vector<8x256xf32>, i32 -> vector<8x256xf32>
    %62 = vector.extract_strided_slice %0 {offsets = [8, 0], sizes = [1, 256], strides = [1, 1]} : vector<9x256xf32> to vector<1x256xf32>
    %63 = vector.broadcast %62 : vector<1x256xf32> to vector<8x256xf32>
    %64 = arith.mulf %61, %63 : vector<8x256xf32>
    %65 = tpu.concatenate %33, %37, %41, %45, %48, %52, %56, %60, %64 in 0 : vector<8x256xf32>, vector<8x256xf32>, vector<8x256xf32>, vector<8x256xf32>, vector<8x256xf32>, vector<8x256xf32>, vector<8x256xf32>, vector<8x256xf32>, vector<8x256xf32> -> vector<72x256xf32>
    %66 = arith.truncf %65 : vector<72x256xf32> to vector<72x256xbf16>
    %c0_18 = arith.constant 0 : index
    %c0_19 = arith.constant 0 : index
    %67 = vector.load %arg7[%c0_18, %c0_19] : memref<16x72xbf16, #tpu.memory_space<vmem>>, vector<16x72xbf16>
    %cst_20 = arith.constant dense<0.000000e+00> : vector<16x256xf32>
    %68 = tpu.matmul %67, %66, %cst_20 {dimension_numbers = #tpu.dot_dimension_numbers<[1], [0], [0], [1], [0, 0, 1, 1], [], []>} : vector<16x72xbf16>, vector<72x256xbf16>, vector<16x256xf32> -> vector<16x256xf32>
    %cst_21 = arith.constant 0.000000e+00 : f32
    %69 = vector.broadcast %cst_21 : f32 to vector<16x256xf32>
    %70 = arith.maximumf %68, %69 : vector<16x256xf32>
    %c0_22 = arith.constant 0 : index
    %c0_23 = arith.constant 0 : index
    %71 = vector.load %arg10[%c0_22, %c0_23] : memref<16x16xf32, #tpu.memory_space<vmem>>, vector<16x16xf32>
    %cst_24 = arith.constant dense<0.000000e+00> : vector<16x256xf32>
    %72 = tpu.matmul %71, %70, %cst_24 {dimension_numbers = #tpu.dot_dimension_numbers<[1], [0], [0], [1], [0, 0, 1, 1], [], []>} : vector<16x16xf32>, vector<16x256xf32>, vector<16x256xf32> -> vector<16x256xf32>
    %cst_25 = arith.constant dense<0.000000e+00> : vector<16xf32>
    %73 = vector.multi_reduction <add>, %72, %cst_25 [1] : vector<16x256xf32> to vector<16xf32>
    %74 = vector.shape_cast %73 : vector<16xf32> to vector<16x1xf32>
    %75 = arith.mulf %70, %70 : vector<16x256xf32>
    %cst_26 = arith.constant dense<0.000000e+00> : vector<16x256xf32>
    %76 = tpu.matmul %71, %75, %cst_26 {dimension_numbers = #tpu.dot_dimension_numbers<[1], [0], [0], [1], [0, 0, 1, 1], [], []>} : vector<16x16xf32>, vector<16x256xf32>, vector<16x256xf32> -> vector<16x256xf32>
    %cst_27 = arith.constant dense<0.000000e+00> : vector<16xf32>
    %77 = vector.multi_reduction <add>, %76, %cst_27 [1] : vector<16x256xf32> to vector<16xf32>
    %78 = vector.shape_cast %77 : vector<16xf32> to vector<16x1xf32>
    %79 = arith.mulf %74, %74 : vector<16x1xf32>
    %80 = arith.subf %78, %79 : vector<16x1xf32>
    %cst_28 = arith.constant 0.000000e+00 : f32
    %81 = vector.broadcast %cst_28 : f32 to vector<16x1xf32>
    %82 = arith.maximumf %80, %81 : vector<16x1xf32>
    %cst_29 = arith.constant 9.99999974E-6 : f32
    %83 = vector.broadcast %cst_29 : f32 to vector<16x1xf32>
    %84 = arith.addf %82, %83 : vector<16x1xf32>
    %85 = math.rsqrt %84 : vector<16x1xf32>
    %86 = vector.broadcast %74 : vector<16x1xf32> to vector<16x256xf32>
    %87 = arith.subf %70, %86 : vector<16x256xf32>
    %88 = vector.broadcast %85 : vector<16x1xf32> to vector<16x256xf32>
    %89 = arith.mulf %87, %88 : vector<16x256xf32>
    %c0_30 = arith.constant 0 : index
    %c0_31 = arith.constant 0 : index
    %90 = vector.load %arg8[%c0_30, %c0_31] : memref<16x1xf32, #tpu.memory_space<vmem>>, vector<16x1xf32>
    %91 = vector.broadcast %90 : vector<16x1xf32> to vector<16x256xf32>
    %92 = arith.mulf %89, %91 : vector<16x256xf32>
    %c0_32 = arith.constant 0 : index
    %c0_33 = arith.constant 0 : index
    %93 = vector.load %arg9[%c0_32, %c0_33] : memref<16x1xf32, #tpu.memory_space<vmem>>, vector<16x1xf32>
    %94 = vector.broadcast %93 : vector<16x1xf32> to vector<16x256xf32>
    %95 = arith.addf %92, %94 : vector<16x256xf32>
    %c17_i32_34 = arith.constant 17 : i32
    %96 = tpu.dynamic_rotate %95 by %c17_i32_34 dim 1 : vector<16x256xf32>, i32 -> vector<16x256xf32>
    %97 = vector.extract_strided_slice %0 {offsets = [0, 0], sizes = [1, 256], strides = [1, 1]} : vector<9x256xf32> to vector<1x256xf32>
    %98 = vector.broadcast %97 : vector<1x256xf32> to vector<16x256xf32>
    %99 = arith.mulf %96, %98 : vector<16x256xf32>
    %c16_i32_35 = arith.constant 16 : i32
    %100 = tpu.dynamic_rotate %95 by %c16_i32_35 dim 1 : vector<16x256xf32>, i32 -> vector<16x256xf32>
    %101 = vector.extract_strided_slice %0 {offsets = [1, 0], sizes = [1, 256], strides = [1, 1]} : vector<9x256xf32> to vector<1x256xf32>
    %102 = vector.broadcast %101 : vector<1x256xf32> to vector<16x256xf32>
    %103 = arith.mulf %100, %102 : vector<16x256xf32>
    %c15_i32_36 = arith.constant 15 : i32
    %104 = tpu.dynamic_rotate %95 by %c15_i32_36 dim 1 : vector<16x256xf32>, i32 -> vector<16x256xf32>
    %105 = vector.extract_strided_slice %0 {offsets = [2, 0], sizes = [1, 256], strides = [1, 1]} : vector<9x256xf32> to vector<1x256xf32>
    %106 = vector.broadcast %105 : vector<1x256xf32> to vector<16x256xf32>
    %107 = arith.mulf %104, %106 : vector<16x256xf32>
    %c1_i32_37 = arith.constant 1 : i32
    %108 = tpu.dynamic_rotate %95 by %c1_i32_37 dim 1 : vector<16x256xf32>, i32 -> vector<16x256xf32>
    %109 = vector.extract_strided_slice %0 {offsets = [3, 0], sizes = [1, 256], strides = [1, 1]} : vector<9x256xf32> to vector<1x256xf32>
    %110 = vector.broadcast %109 : vector<1x256xf32> to vector<16x256xf32>
    %111 = arith.mulf %108, %110 : vector<16x256xf32>
    %112 = vector.extract_strided_slice %0 {offsets = [4, 0], sizes = [1, 256], strides = [1, 1]} : vector<9x256xf32> to vector<1x256xf32>
    %113 = vector.broadcast %112 : vector<1x256xf32> to vector<16x256xf32>
    %114 = arith.mulf %95, %113 : vector<16x256xf32>
    %c255_i32_38 = arith.constant 255 : i32
    %115 = tpu.dynamic_rotate %95 by %c255_i32_38 dim 1 : vector<16x256xf32>, i32 -> vector<16x256xf32>
    %116 = vector.extract_strided_slice %0 {offsets = [5, 0], sizes = [1, 256], strides = [1, 1]} : vector<9x256xf32> to vector<1x256xf32>
    %117 = vector.broadcast %116 : vector<1x256xf32> to vector<16x256xf32>
    %118 = arith.mulf %115, %117 : vector<16x256xf32>
    %c241_i32_39 = arith.constant 241 : i32
    %119 = tpu.dynamic_rotate %95 by %c241_i32_39 dim 1 : vector<16x256xf32>, i32 -> vector<16x256xf32>
    %120 = vector.extract_strided_slice %0 {offsets = [6, 0], sizes = [1, 256], strides = [1, 1]} : vector<9x256xf32> to vector<1x256xf32>
    %121 = vector.broadcast %120 : vector<1x256xf32> to vector<16x256xf32>
    %122 = arith.mulf %119, %121 : vector<16x256xf32>
    %c240_i32_40 = arith.constant 240 : i32
    %123 = tpu.dynamic_rotate %95 by %c240_i32_40 dim 1 : vector<16x256xf32>, i32 -> vector<16x256xf32>
    %124 = vector.extract_strided_slice %0 {offsets = [7, 0], sizes = [1, 256], strides = [1, 1]} : vector<9x256xf32> to vector<1x256xf32>
    %125 = vector.broadcast %124 : vector<1x256xf32> to vector<16x256xf32>
    %126 = arith.mulf %123, %125 : vector<16x256xf32>
    %c239_i32_41 = arith.constant 239 : i32
    %127 = tpu.dynamic_rotate %95 by %c239_i32_41 dim 1 : vector<16x256xf32>, i32 -> vector<16x256xf32>
    %128 = vector.extract_strided_slice %0 {offsets = [8, 0], sizes = [1, 256], strides = [1, 1]} : vector<9x256xf32> to vector<1x256xf32>
    %129 = vector.broadcast %128 : vector<1x256xf32> to vector<16x256xf32>
    %130 = arith.mulf %127, %129 : vector<16x256xf32>
    %131 = tpu.concatenate %99, %103, %107, %111, %114, %118, %122, %126, %130 in 0 : vector<16x256xf32>, vector<16x256xf32>, vector<16x256xf32>, vector<16x256xf32>, vector<16x256xf32>, vector<16x256xf32>, vector<16x256xf32>, vector<16x256xf32>, vector<16x256xf32> -> vector<144x256xf32>
    %132 = arith.truncf %131 : vector<144x256xf32> to vector<144x256xbf16>
    %c0_42 = arith.constant 0 : index
    %c0_43 = arith.constant 0 : index
    %133 = vector.load %arg11[%c0_42, %c0_43] : memref<16x144xbf16, #tpu.memory_space<vmem>>, vector<16x144xbf16>
    %cst_44 = arith.constant dense<0.000000e+00> : vector<16x256xf32>
    %134 = tpu.matmul %133, %132, %cst_44 {dimension_numbers = #tpu.dot_dimension_numbers<[1], [0], [0], [1], [0, 0, 1, 1], [], []>} : vector<16x144xbf16>, vector<144x256xbf16>, vector<16x256xf32> -> vector<16x256xf32>
    %cst_45 = arith.constant 0.000000e+00 : f32
    %135 = vector.broadcast %cst_45 : f32 to vector<16x256xf32>
    %136 = arith.maximumf %134, %135 : vector<16x256xf32>
    %c0_46 = arith.constant 0 : index
    %c0_47 = arith.constant 0 : index
    %c0_48 = arith.constant 0 : index
    %137 = vector.load %arg12[%c0_46, %c0_47, %c0_48] : memref<1x16x256xf32, #tpu.memory_space<vmem>>, vector<1x16x256xf32>
    %138 = vector.shape_cast %137 : vector<1x16x256xf32> to vector<16x256xf32>
    %139 = vector.shape_cast %136 : vector<16x256xf32> to vector<1x16x256xf32>
    tpu.vector_store %arg12[%c0_46, %c0_47, %c0_48], %139 {strides = array<i32>} : memref<1x16x256xf32, #tpu.memory_space<vmem>>, vector<1x16x256xf32>,
    return
  }
  func.func @transform_0(%arg0: i32) -> (i32, i32, i32) {
    %c0_i32 = arith.constant 0 : i32
    %c0_i32_0 = arith.constant 0 : i32
    %c0_i32_1 = arith.constant 0 : i32
    return %arg0, %c0_i32, %c0_i32_0 : i32, i32, i32
  }
  func.func @transform_1(%arg0: i32) -> (i32, i32) {
    %c0_i32 = arith.constant 0 : i32
    %c0_i32_0 = arith.constant 0 : i32
    %c0_i32_1 = arith.constant 0 : i32
    return %c0_i32, %c0_i32_0 : i32, i32
  }
  func.func @transform_2(%arg0: i32) -> (i32, i32) {
    %c0_i32 = arith.constant 0 : i32
    %c0_i32_0 = arith.constant 0 : i32
    %c0_i32_1 = arith.constant 0 : i32
    return %c0_i32, %c0_i32_0 : i32, i32
  }
  func.func @transform_3(%arg0: i32) -> (i32, i32) {
    %c0_i32 = arith.constant 0 : i32
    %c0_i32_0 = arith.constant 0 : i32
    %c0_i32_1 = arith.constant 0 : i32
    return %c0_i32, %c0_i32_0 : i32, i32
  }
  func.func @transform_4(%arg0: i32) -> (i32, i32) {
    %c0_i32 = arith.constant 0 : i32
    %c0_i32_0 = arith.constant 0 : i32
    %c0_i32_1 = arith.constant 0 : i32
    return %c0_i32, %c0_i32_0 : i32, i32
  }
  func.func @transform_5(%arg0: i32) -> (i32, i32) {
    %c0_i32 = arith.constant 0 : i32
    %c0_i32_0 = arith.constant 0 : i32
    %c0_i32_1 = arith.constant 0 : i32
    return %c0_i32, %c0_i32_0 : i32, i32
  }
  func.func @transform_6(%arg0: i32) -> (i32, i32) {
    %c0_i32 = arith.constant 0 : i32
    %c0_i32_0 = arith.constant 0 : i32
    %c0_i32_1 = arith.constant 0 : i32
    return %c0_i32, %c0_i32_0 : i32, i32
  }
  func.func @transform_7(%arg0: i32) -> (i32, i32) {
    %c0_i32 = arith.constant 0 : i32
    %c0_i32_0 = arith.constant 0 : i32
    %c0_i32_1 = arith.constant 0 : i32
    return %c0_i32, %c0_i32_0 : i32, i32
  }
  func.func @transform_8(%arg0: i32) -> (i32, i32) {
    %c0_i32 = arith.constant 0 : i32
    %c0_i32_0 = arith.constant 0 : i32
    %c0_i32_1 = arith.constant 0 : i32
    return %c0_i32, %c0_i32_0 : i32, i32
  }
  func.func @transform_9(%arg0: i32) -> (i32, i32) {
    %c0_i32 = arith.constant 0 : i32
    %c0_i32_0 = arith.constant 0 : i32
    %c0_i32_1 = arith.constant 0 : i32
    return %c0_i32, %c0_i32_0 : i32, i32
  }
  func.func @transform_10(%arg0: i32) -> (i32, i32) {
    %c0_i32 = arith.constant 0 : i32
    %c0_i32_0 = arith.constant 0 : i32
    %c0_i32_1 = arith.constant 0 : i32
    return %c0_i32, %c0_i32_0 : i32, i32
  }
  func.func @transform_11(%arg0: i32) -> (i32, i32, i32) {
    %c0_i32 = arith.constant 0 : i32
    %c0_i32_0 = arith.constant 0 : i32
    %c0_i32_1 = arith.constant 0 : i32
    return %arg0, %c0_i32, %c0_i32_0 : i32, i32, i32
  }
}

</mosaic_0001>

<bundles_post_ra>
// kernel: upsampling_2d_forward.1
= control target key start
LH: loop header
LB: loop body
LE: loop exit
PB: predicated region body
PF: predicated region fallthrough
CT: control target
= control target key end

     0   :  { %s1550_s17 = smov 0   ;;  %s2018_s0 = inlined_call_operand.vmem [shape: f32[2,8,64], index: 0, kind: input, shape index: {}]   ;;  %s2019_s1 = inlined_call_operand.vmem [shape: f32[64,256], index: 1, kind: input, shape index: {}]   ;;  %s2020_s2 = inlined_call_operand.vmem [shape: f32[9,256], index: 2, kind: input, shape index: {}]   ;;  %s2021_s3 = inlined_call_operand.vmem [shape: f32[8,1], index: 3, kind: input, shape index: {}]   ;;  %s2022_s4 = inlined_call_operand.vmem [shape: f32[8,1], index: 4, kind: input, shape index: {}]   ;;  %s2023_s5 = inlined_call_operand.vmem [shape: f32[8,8], index: 5, kind: input, shape index: {}]   ;;  %s2024_s6 = inlined_call_operand.vmem [shape: bf16[16,72], index: 6, kind: input, shape index: {}]   ;;  %s2025_s7 = inlined_call_operand.vmem [shape: f32[16,1], index: 7, kind: input, shape index: {}]   ;;  %s2026_s8 = inlined_call_operand.vmem [shape: f32[16,1], index: 8, kind: input, shape index: {}]   ;;  %s2027_s9 = inlined_call_operand.vmem [shape: f32[16,16], index: 9, kind: input, shape index: {}]   ;;  %s2028_s10 = inlined_call_operand.vmem [shape: bf16[16,144], index: 10, kind: input, shape index: {}]   ;;  %s2029_s11 = inlined_call_operand.vmem [shape: f32[2,16,256], index: 11, kind: output, shape index: {}]  }
   0x1 LB: > { %s1376_s18 = sadd.s32 4294967295, %s1477_s17   ;;  %p1380_p0 = scmp.ge.s32.totalorder %s1477_s17, 1  ;;  %s1477_s17 = sphi %s1550_s17, %s21_s17  }
   0x2   : > { %p336_p1 = scmp.lt.s32.totalorder %s1477_s17, 3 }
   0x4   : > { %p337_p2 = pnand %p1380_p0, %p336_p1 }
   0x5   : > { %p375_p3 = scmp.lt.s32.totalorder (!%p337_p2), %s1376_s18, 1  ;;  %v1479_v0 = vmov (!%p337_p2), 0.0   ;;  %vm1480_vm0 = vmmov (!%p337_p2), 0   ;;  %v390_v1 = vld [vmem:[%s2023_s5] sm:$0xff] (!%p337_p2)  ;;  %vm391_vm1 = vcmask (!%p337_p2), 64512   ;;  %v1481_v5 = vmov (!%p337_p2), 0  }
   0x6   : > { %340 = sbr.rel (%p337_p2) target bundleno = 1834 (0x72a), region = 64  ;;  %1406 = vmatprep.subr.mxu0 (!%p337_p2), %v1479_v0  ;;  %1408 = vmatprep.mubr.msk.f32.mxu0 (!%p337_p2), %vm1480_vm0, %v1479_v0  ;;  %v550_v4 = vld [vmem:[%s2021_s3] sm:$0xff] (!%p337_p2)  ;;  %vm465_vm2 = vcmask (!%p337_p2), 523264   ;;  %v565_v13 = vld [vmem:[%s2019_s1 + $0x8] sm:$0xff] (!%p337_p2)  ;;  %v567_v14 = vld [vmem:[%s2019_s1 + $0x18] sm:$0xff] (!%p337_p2)  ;;  %s1482_s27 = smov (!%p337_p2), 16   ;;  %v658_v55 = vlaneseq (!%p337_p2) }
   0x7   : > { %1411 = vmatprep.subr.mxu1 (!%p337_p2), %v1479_v0  ;;  %1413 = vmatprep.mubr.msk.f32.mxu1 (!%p337_p2), %vm1480_vm0, %v1479_v0  ;;  %v557_v6 = vld [vmem:[%s2022_s4] sm:$0xff] (!%p337_p2)  ;;  %v1416_v15 = vpack.c.bf16 (!%p337_p2), %v567_v14, %v565_v13  ;;  %v566_v17 = vld [vmem:[%s2019_s1 + $0x10] sm:$0xff] (!%p337_p2)  ;;  %v569_v19 = vld [vmem:[%s2019_s1 + $0x28] sm:$0xff] (!%p337_p2)  ;;  %s1483_s28 = smov (!%p337_p2), 17   ;;  %s1484_s29 = smov (!%p337_p2), 15   ;;  %vm823_vm11 = vcmask (!%p337_p2), 1043456  }
   0x8   : > { %1459 = vset.pattern.permute.xlu1 (!%p337_p2), %v1481_v5  ;;  %1460 = vset.pattern.permute.xlu0 (!%p337_p2), %v1481_v5  ;;  %v564_v16 = vld [vmem:[%s2019_s1] sm:$0xff] (!%p337_p2)  ;;  %v571_v20 = vld [vmem:[%s2019_s1 + $0x38] sm:$0xff] (!%p337_p2)  ;;  %v570_v23 = vld [vmem:[%s2019_s1 + $0x30] sm:$0xff] (!%p337_p2)  ;;  %s1485_s30 = smov (!%p337_p2), 1   ;;  %s1486_s12 = smov (!%p337_p2), 127   ;;  %v1672_v57 = vshrl.u32 (!%p337_p2), %v658_v55, 7 }
   0x9   : > { %553 = vperm.xlu1 (!%p337_p2), %1459, %v550_v4   ;;  %v1418_v18 = vpack.c.bf16 (!%p337_p2), %v566_v17, %v564_v16  ;;  %v1420_v21 = vpack.c.bf16 (!%p337_p2), %v571_v20, %v569_v19  ;;  %v568_v22 = vld [vmem:[%s2019_s1 + $0x20] sm:$0xff] (!%p337_p2)  ;;  %v573_v25 = vld [vmem:[%s2019_s1 + $0x48] sm:$0xff] (!%p337_p2)  ;;  %v575_v26 = vld [vmem:[%s2019_s1 + $0x58] sm:$0xff] (!%p337_p2)  ;;  %s1487_s13 = smov (!%p337_p2), 113   ;;  %s1488_s14 = smov (!%p337_p2), 112   ;;  %v1674_v60 = vand.u32 (!%p337_p2), 127, %v658_v55 }
   0xa   : > { %v1422_v24 = vpack.c.bf16 (!%p337_p2), %v570_v23, %v568_v22  ;;  %v1424_v27 = vpack.c.bf16 (!%p337_p2), %v575_v26, %v573_v25  ;;  %v572_v28 = vld [vmem:[%s2019_s1 + $0x40] sm:$0xff] (!%p337_p2)  ;;  %v574_v29 = vld [vmem:[%s2019_s1 + $0x50] sm:$0xff] (!%p337_p2)  ;;  %v577_v31 = vld [vmem:[%s2019_s1 + $0x68] sm:$0xff] (!%p337_p2)  ;;  %s1489_s15 = smov (!%p337_p2), 111   ;;  %v716_v61 = vsub.s32 (!%p337_p2), 3, %v1672_v57  ;;  %v665_v62 = vsub.s32 (!%p337_p2), 0, %v1672_v57 }
   0xb   : > { %v1426_v30 = vpack.c.bf16 (!%p337_p2), %v574_v29, %v572_v28  ;;  %v579_v32 = vld [vmem:[%s2019_s1 + $0x78] sm:$0xff] (!%p337_p2)  ;;  %v576_v34 = vld [vmem:[%s2019_s1 + $0x60] sm:$0xff] (!%p337_p2)  ;;  %v578_v35 = vld [vmem:[%s2019_s1 + $0x70] sm:$0xff] (!%p337_p2)  ;;  %v682_v63 = vsub.s32 (!%p337_p2), 1, %v1672_v57  ;;  %vm660_vm3 = vcmp.lt.s32.totalorder (!%p337_p2), %v1674_v60, 17  ;;  %v699_v4 = vsub.s32 (!%p337_p2), 2, %v1672_v57 }
   0xc   : > { %v1428_v33 = vpack.c.bf16 (!%p337_p2), %v579_v32, %v577_v31  ;;  %v1430_v36 = vpack.c.bf16 (!%p337_p2), %v578_v35, %v576_v34  ;;  %vm711_vm4 = vcmp.lt.s32.totalorder (!%p337_p2), %v1674_v60, 1  ;;  %vm677_vm5 = vcmp.lt.s32.totalorder (!%p337_p2), %v1674_v60, 16 }
   0xd   : > { %s2031_s18 = smov (!%p375_p3, %s1376_s18), 1  ;;  %560 = vperm.xlu1 %1459, %v557_v6   ;;  %vm738_vm6 = vcmp.lt.s32.totalorder %v1674_v60, 127  ;;  %vm694_vm7 = vcmp.lt.s32.totalorder %v1674_v60, 15  ;;  %v760_v35 = vsub.s32 6, %v1672_v57  ;;  %vm755_vm8 = vcmp.lt.s32.totalorder %v1674_v60, 113 }
   0xe   : > { %s1381_s19 = sshll.u32 %s2031_s18, 3  ;;  %vm772_vm9 = vcmp.lt.s32.totalorder %v1674_v60, 112  ;;  %vm789_vm10 = vcmp.lt.s32.totalorder %v1674_v60, 111  ;;  %vm819_vm12 = vcmask 588800   ;;  %vm879_vm13 = vcmask 130048  }
   0xf   : > { %s378_s22 = scalar_lea.vmem %s2018_s0, %s1381_s19 }
  0x10   : > { %v1571_v2 = vld [vmem:[%s378_s22] sm:$0xff] }
  0x11   : > { %1407 = vmatpush3.msra.mxu0 %v1571_v2  ;;  %v469_v3 = vmul.f32 %v1571_v2, %v1571_v2 }
  0x12   : > { %1409 = vmatmul.mubr.msk.f32.vlgmr.msra.gmra.mrb[0].mxu0 %vm391_vm1, %v390_v1  ;;  %1417 = vmatprep.subr.bf16.mxu0 %v1416_v15 }
  0x13   : > { %1412 = vmatpush3.msra.mxu1 %v469_v3  ;;  %647 = vmatprep.mubr.f32.mxu0 %v1479_v0 }
  0x14   : > { %1414 = vmatmul.mubr.msk.f32.vlgmr.msra.gmra.mrb[0].mxu1 %vm391_vm1, %v390_v1  ;;  %1419 = vmatpush1.bf16.msra.mxu0 %v1418_v18  ;;  %v1682_v1 = vld [vmem:[%s2020_s2] sm:$0xff] }
  0x15   : > { %950 = vmatprep.mubr.f32.mxu1 %v1479_v0  ;;  %1421 = vmatprep.subr.bf16.mxu0 %v1420_v21  ;;  %v1692_v6 = vrot.slane %v1682_v1, %v716_v61  ;;  %v1717_v18 = vrot.slane %v1682_v1, %v699_v4 }
  0x18   : > { %1423 = vmatpush1.bf16.msra.mxu0 %v1422_v24 }
  0x19   : > { %1425 = vmatprep.subr.bf16.mxu0 %v1424_v27 }
  0x1c   : > { %1427 = vmatpush1.bf16.msra.mxu0 %v1426_v30 }
  0x1d   : > { %1429 = vmatprep.subr.bf16.mxu0 %v1428_v33 }
  0x20   : > { %1431 = vmatpush1.bf16.msra.mxu0 %v1430_v36  ;;  %v777_v36 = vsub.s32 7, %v1672_v57 }
  0x88   : > { %v554_v43 = vpop.permute.xlu1 %553 }
  0x8c   : > { %v561_v48 = vpop.permute.xlu1 %560 }
  0xe5   : > { %v461_v7 = vpop.f32.mrb[0].mxu0 }
  0xe6   : > { %v1410_v8 = vpop.f32.mrb[1].mxu0  ;;  %v466_v9 = vsel %vm465_vm2, %v461_v7, 0.0  ;;  %v726_v7 = vsub.s32 4, %v1672_v57 }
  0xe7   : > { %467 = vadd.xlane.f32.xlu0 %v466_v9  ;;  %v536_v10 = vpop.f32.mrb[0].mxu1  ;;  %v1696_v8 = vrot.slane %v1682_v1, %v665_v62 }
  0xe8   : > { %v1415_v11 = vpop.f32.mrb[1].mxu1  ;;  %v540_v12 = vsel %vm465_vm2, %v536_v10, 0.0 }
  0xe9   : > { %v1702_v11 = vrot.slane %v1682_v1, %v682_v63 }
  0xeb   : > { %541 = vadd.xlane.f32.xlu0 %v540_v12 }
 0x174   : > { %v468_v37 = vpop.xlane.xlu0 %467 }
 0x175   : > { %v543_v38 = vmul.f32 %v468_v37, %v468_v37  ;;  %v548_v44 = vsub.f32 %v1571_v2, %v468_v37  ;;  %v743_v2 = vsub.s32 5, %v1672_v57 }
 0x177   : > { %v1734_v28 = vrot.slane %v1682_v1, %v743_v2 }
 0x178   : > { %v542_v39 = vpop.xlane.xlu0 %541 }
 0x179   : > { %v544_v40 = vsub.f32 %v542_v39, %v543_v38 }
 0x17b   : > { %v545_v41 = vmax.f32 %v544_v40, 0.0 }
 0x17d   : > { %v546_v42 = vadd.f32 1e-05, %v545_v41 }
 0x17f   : > { %1465 = vrsqrt.f32 %v546_v42 }
 0x189   : > { %v1466_v45 = vpop.eup %1465 }
 0x18a   : > { %v549_v46 = vmul.f32 %v1466_v45, %v548_v44  ;;  %v1754_v45 = vrot.slane %v1682_v1, %v726_v7 }
 0x18c   : > { %v556_v47 = vmul.f32 %v554_v43, %v549_v46 }
 0x18e   : > { %v563_v49 = vadd.f32 %v561_v48, %v556_v47 }
 0x190   : > { %1386 = vmatmul.mubr.msk.f32.vlgmr.msra.gmra.mrb[2].mxu0 %vm465_vm2, %v563_v49 }
 0x191   : > { %862 = vmatprep.mubr.bf16.mxu0 %v1481_v5  ;;  %v386_v5 = vld [vmem:[%s2020_s2 + $0x8] sm:$0xff] }
 0x192   : > { %v1698_v10 = vrot.slane %v386_v5, %v665_v62  ;;  %v1704_v12 = vrot.slane %v386_v5, %v682_v63  ;;  %v1706_v13 = vrot.slane %v386_v5, %v716_v61  ;;  %v1713_v16 = vrot.slane %v386_v5, %v743_v2 }
 0x193   : > { %v1719_v19 = vrot.slane %v386_v5, %v699_v4  ;;  %v1738_v30 = vrot.slane %v386_v5, %v726_v7  ;;  %v1769_v57 = vrot.slane %v386_v5, %v777_v36  ;;  %v1789_v7 = vld [vmem:[%s2020_s2 + $0x10] ss:$0 sm:$0xff] }
 0x263   : > { %v1636_v50 = vpop.f32.mrb[2].mxu0 }
 0x264   : > { %673 = vrot.lane.b32.xlu1 %v1636_v50, %s1482_s27  ;;  %654 = vrot.lane.b32.xlu0 %v1636_v50, %s1483_s28  ;;  %v1642_v51 = vpop.f32.mrb[3].mxu0 }
 0x265   : > { %v733_v49 = vmul.f32 %v1738_v30, %v1642_v51 }
 0x268   : > { %690 = vrot.lane.b32.xlu1 %v1636_v50, %s1484_s29  ;;  %709 = vrot.lane.b32.xlu0 %v1642_v51, %s1485_s30 }
 0x26c   : > { %707 = vrot.lane.b32.xlu1 %v1636_v50, %s1485_s30  ;;  %736 = vrot.lane.b32.xlu0 %v1642_v51, %s1486_s12 }
 0x270   : > { %734 = vrot.lane.b32.xlu1 %v1636_v50, %s1486_s12  ;;  %753 = vrot.lane.b32.xlu0 %v1642_v51, %s1487_s13 }
 0x274   : > { %770 = vrot.lane.b32.xlu0 %v1642_v51, %s1488_s14  ;;  %656 = vrot.lane.b32.xlu1 %v1642_v51, %s1483_s28 }
 0x278   : > { %787 = vrot.lane.b32.xlu0 %v1642_v51, %s1489_s15  ;;  %675 = vrot.lane.b32.xlu1 %v1642_v51, %s1482_s27 }
 0x27c   : > { %692 = vrot.lane.b32.xlu1 %v1642_v51, %s1484_s29  ;;  %v732_v51 = vmul.f32 %v1754_v45, %v1636_v50 }
 0x280   : > { %751 = vrot.lane.b32.xlu1 %v1636_v50, %s1487_s13 }
 0x284   : > { %768 = vrot.lane.b32.xlu1 %v1636_v50, %s1488_s14 }
 0x288   : > { %785 = vrot.lane.b32.xlu1 %v1636_v50, %s1489_s15 }
 0x2d6   : > { %v674_v52 = vpop.permute.xlu1 %673  ;;  %v655_v54 = vpop.permute.xlu0 %654 }
 0x2da   : > { %v691_v53 = vpop.permute.xlu1 %690  ;;  %v710_v58 = vpop.permute.xlu0 %709 }
 0x2de   : > { %v708_v56 = vpop.permute.xlu1 %707  ;;  %v737_v9 = vpop.permute.xlu0 %736 }
 0x2df   : > { %v712_v20 = vsel %vm711_vm4, %v708_v56, %v710_v58  ;;  %v713_v21 = vsel %vm711_vm4, %v710_v58, %v708_v56  ;;  %v1767_v56 = vrot.slane %v1682_v1, %v777_v36 }
 0x2e0   : > { %v722_v37 = vmul.f32 %v1692_v6, %v713_v21  ;;  %v723_v38 = vmul.f32 %v1706_v13, %v712_v20 }
 0x2e2   : > { %v735_v59 = vpop.permute.xlu1 %734  ;;  %v754_v31 = vpop.permute.xlu0 %753 }
 0x2e3   : > { %v740_v29 = vsel %vm738_vm6, %v737_v9, %v735_v59  ;;  %v739_v41 = vsel %vm738_vm6, %v735_v59, %v737_v9  ;;  %v1794_v9 = vld [vmem:[%s2020_s2 + $0x18] ss:$0 sm:$0xff] }
 0x2e4   : > { %v750_v42 = vmul.f32 %v1713_v16, %v740_v29  ;;  %v1461_v29 = vld [vmem:[%s2024_s6] sm:$0xff]  }
 0x2e6   : > { %v657_v3 = vpop.permute.xlu1 %656  ;;  %v771_v55 = vpop.permute.xlu0 %770  ;;  %v807_v58 = vpack.c.bf16 %v750_v42, %v733_v49  ;;  %v878_v49 = vld [vmem:[%s2027_s9 + $0x8] sm:$0xff] }
 0x2e7   : > { %v661_v14 = vsel %vm660_vm3, %v655_v54, %v657_v3  ;;  %v662_v15 = vsel %vm660_vm3, %v657_v3, %v655_v54  ;;  %v1763_v54 = vrot.slane %v386_v5, %v760_v35 }
 0x2e8   : > { %v671_v24 = vmul.f32 %v1696_v8, %v662_v15  ;;  %v672_v25 = vmul.f32 %v1698_v10, %v661_v14 }
 0x2ea   : > { %v676_v17 = vpop.permute.xlu1 %675  ;;  %v788_v14 = vpop.permute.xlu0 %787 }
 0x2eb   : > { %v678_v22 = vsel %vm677_vm5, %v674_v52, %v676_v17  ;;  %v679_v23 = vsel %vm677_vm5, %v676_v17, %v674_v52  ;;  %v749_v52 = vmul.f32 %v1734_v28, %v739_v41 }
 0x2ec   : > { %v688_v26 = vmul.f32 %v1702_v11, %v679_v23  ;;  %v689_v27 = vmul.f32 %v1704_v12, %v678_v22 }
 0x2ed   : > { %v806_v63 = vpack.c.bf16 %v749_v52, %v732_v51 }
 0x2ee   : > { %v802_v32 = vpack.c.bf16 %v688_v26, %v671_v24  ;;  %v693_v33 = vpop.permute.xlu1 %692  ;;  %v803_v34 = vpack.c.bf16 %v689_v27, %v672_v25 }
 0x2ef   : > { %v695_v39 = vsel %vm694_vm7, %v691_v53, %v693_v33  ;;  %v696_v40 = vsel %vm694_vm7, %v693_v33, %v691_v53  ;;  %v1761_v53 = vrot.slane %v1682_v1, %v760_v35 }
 0x2f0   : > { %v705_v43 = vmul.f32 %v1717_v18, %v696_v40  ;;  %v706_v44 = vmul.f32 %v1719_v19, %v695_v39  ;;  %830 = vmatprep.subr.bf16.mxu0 %v803_v34 }
 0x2f1   : > { %831 = vmatpush1.bf16.msra.mxu0 %v802_v32 }
 0x2f2   : > { %v804_v46 = vpack.c.bf16 %v722_v37, %v705_v43  ;;  %v752_v47 = vpop.permute.xlu1 %751  ;;  %v805_v48 = vpack.c.bf16 %v723_v38, %v706_v44 }
 0x2f3   : > { %v756_v59 = vsel %vm755_vm8, %v752_v47, %v754_v31  ;;  %v757_v61 = vsel %vm755_vm8, %v754_v31, %v752_v47 }
 0x2f4   : > { %832 = vmatprep.subr.bf16.mxu0 %v805_v48  ;;  %v766_v50 = vmul.f32 %v1761_v53, %v756_v59  ;;  %v767_v3 = vmul.f32 %v1763_v54, %v757_v61  ;;  %v877_v48 = vld [vmem:[%s2027_s9] sm:$0xff] }
 0x2f5   : > { %833 = vmatpush1.bf16.msra.mxu0 %v804_v46 }
 0x2f6   : > { %v769_v62 = vpop.permute.xlu1 %768  ;;  %834 = vmatprep.subr.bf16.mxu0 %v807_v58 }
 0x2f7   : > { %v773_v1 = vsel %vm772_vm9, %v769_v62, %v771_v55  ;;  %v774_v2 = vsel %vm772_vm9, %v771_v55, %v769_v62 }
 0x2f8   : > { %v783_v4 = vmul.f32 %v1767_v56, %v773_v1  ;;  %v784_v5 = vmul.f32 %v1769_v57, %v774_v2 }
 0x2f9   : > { %835 = vmatpush1.bf16.msra.mxu0 %v806_v63 }
 0x2fa   : > { %v808_v15 = vpack.c.bf16 %v783_v4, %v766_v50  ;;  %v786_v17 = vpop.permute.xlu1 %785  ;;  %v809_v20 = vpack.c.bf16 %v784_v5, %v767_v3  ;;  %v1090_v4 = vld [vmem:[%s2026_s8] sm:$0xff] }
 0x2fb   : > { %v790_v21 = vsel %vm789_vm10, %v786_v17, %v788_v14  ;;  %v791_v22 = vsel %vm789_vm10, %v788_v14, %v786_v17  ;;  %v1074_v5 = vld [vmem:[%s2025_s7] sm:$0xff]  ;;  %v1091_v14 = vld [vmem:[%s2026_s8 + $0x8] sm:$0xff] }
 0x2fc   : > { %v800_v23 = vmul.f32 %v1789_v7, %v790_v21  ;;  %v801_v24 = vmul.f32 %v1794_v9, %v791_v22  ;;  %836 = vmatprep.subr.bf16.mxu0 %v809_v20 }
 0x2fd   : > { %837 = vmatpush1.bf16.msra.mxu0 %v808_v15 }
 0x2fe   : > { %v810_v25 = vpack.c.bf16 %v800_v23, %v800_v23  ;;  %v811_v26 = vpack.c.bf16 %v801_v24, %v801_v24 }
 0x300   : > { %1390 = vmatprep.subr.msk.bf16.mxu0 %vm823_vm11, %v811_v26  ;;  %v825_v27 = vsel %vm823_vm11, %v810_v25, 0 }
 0x301   : > { %839 = vmatpush1.bf16.msra.mxu0 %v825_v27 }
 0x304   : > { %1391 = vmatmul.mubr.msk.bf16.vlgmr.msra.gmra.mrb[4].mxu0 %vm819_vm12, %v1461_v29 }
 0x305   : > { %1037 = vmatprep.mubr.f32.mxu0 %v1479_v0 }
 0x3d7   : > { %v864_v31 = vpop.f32.mrb[4].mxu0 }
 0x3d8   : > { %v866_v32 = vpop.f32.mrb[5].mxu0  ;;  %v1808_v35 = vmax.f32 %v864_v31, 0.0 }
 0x3d9   : > { %v1806_v33 = vmax.f32 %v866_v32, 0.0  ;;  %v868_v34 = vpop.f32.mrb[6].mxu0 }
 0x3da   : > { %v1810_v36 = vmax.f32 %v868_v34, 0.0  ;;  %v870_v37 = vpop.f32.mrb[7].mxu0  ;;  %v969_v43 = vmul.f32 %v1808_v35, %v1808_v35 }
 0x3db   : > { %v1812_v38 = vmax.f32 %v870_v37, 0.0  ;;  %v970_v40 = vmul.f32 %v1806_v33, %v1806_v33 }
 0x3dc   : > { %v971_v39 = vmul.f32 %v1810_v36, %v1810_v36  ;;  %v1434_v44 = vpack.c.bf16 %v1810_v36, %v1808_v35 }
 0x3dd   : > { %v972_v41 = vmul.f32 %v1812_v38, %v1812_v38  ;;  %v1432_v42 = vpack.c.bf16 %v1812_v38, %v1806_v33 }
 0x3de   : > { %v1438_v47 = vpack.c.bf16 %v971_v39, %v969_v43 }
 0x3df   : > { %1433 = vmatprep.subr.bf16.mxu1 %v1432_v42  ;;  %v1436_v46 = vpack.c.bf16 %v972_v41, %v970_v40 }
 0x3e0   : > { %1435 = vmatpush1.bf16.msra.mxu1 %v1434_v44 }
 0x3e1   : > { %1437 = vmatprep.subr.bf16.mxu0 %v1436_v46 }
 0x3e2   : > { %1439 = vmatpush1.bf16.msra.mxu0 %v1438_v47 }
 0x3e3   : > { %1392 = vmatmul.mubr.msk.f32.vlgmr.msra.gmra.mrb[2].mxu1 %vm879_vm13, %v877_v48 }
 0x3e4   : > { %956 = vmatprep.mubr.f32.mxu1 %v1479_v0 }
 0x3e5   : > { %1394 = vmatmul.mubr.msk.f32.vlgmr.msra.gmra.mrb[8].mxu0 %vm879_vm13, %v877_v48 }
 0x3e6   : > { %1043 = vmatprep.mubr.f32.mxu0 %v1479_v0  ;;  %v1075_v0 = vld [vmem:[%s2025_s7 + $0x8] sm:$0xff] }
 0x3e7   : > { %1393 = vmatmul.mubr.msk.f32.gmra.mrb[4].mxu1 %vm879_vm13, %v878_v49 }
 0x3e9   : > { %1395 = vmatmul.mubr.msk.f32.gmra.mrb[10].mxu0 %vm879_vm13, %v878_v49 }
 0x4b6   : > { %v952_v52 = vpop.f32.mrb[2].mxu1 }
 0x4b7   : > { %v954_v55 = vpop.f32.mrb[3].mxu1 }
 0x4b8   : > { %v963_v58 = vadd.f32 %v954_v55, %v952_v52  ;;  %v1039_v51 = vpop.f32.mrb[8].mxu0 }
 0x4b9   : > { %v1041_v59 = vpop.f32.mrb[9].mxu0 }
 0x4ba   : > { %v1050_v61 = vadd.f32 %v1041_v59, %v1039_v51  ;;  %964 = vadd.xlane.f32.xlu1 %v963_v58  ;;  %v958_v62 = vpop.f32.mrb[4].mxu1 }
 0x4bb   : > { %v960_v63 = vpop.f32.mrb[5].mxu1 }
 0x4bc   : > { %1051 = vadd.xlane.f32.xlu0 %v1050_v61  ;;  %v966_v1 = vadd.f32 %v960_v63, %v958_v62  ;;  %v1045_v2 = vpop.f32.mrb[10].mxu0 }
 0x4bd   : > { %v1047_v50 = vpop.f32.mrb[11].mxu0 }
 0x4be   : > { %v1053_v3 = vadd.f32 %v1047_v50, %v1045_v2 }
 0x4c0   : > { %967 = vadd.xlane.f32.xlu0 %v966_v1 }
 0x4cb   : > { %1083 = vperm.xlu1 %1459, %v1075_v0  }
 0x4cf   : > { %1094 = vperm.xlu1 %1459, %v1090_v4  }
 0x4d6   : > { %1078 = vperm.xlu0 %1460, %v1074_v5  }
 0x4f3   : > { %1054 = vadd.xlane.f32.xlu1 %v1053_v3 }
 0x504   : > { %1099 = vperm.xlu1 %1459, %v1091_v14  }
 0x547   : > { %v965_v15 = vpop.xlane.xlu1 %964 }
 0x548   : > { %v1056_v17 = vmul.f32 %v965_v15, %v965_v15  ;;  %v1066_v26 = vsub.f32 %v1808_v35, %v965_v15  ;;  %v1067_v27 = vsub.f32 %v1806_v33, %v965_v15 }
 0x549   : > { %v1052_v20 = vpop.xlane.xlu0 %1051 }
 0x54a   : > { %v1058_v21 = vsub.f32 %v1052_v20, %v1056_v17 }
 0x54b   : > { %v1084_v25 = vpop.permute.xlu1 %1083 }
 0x54c   : > { %v1060_v22 = vmax.f32 %v1058_v21, 0.0 }
 0x54d   : > { %v968_v24 = vpop.xlane.xlu0 %967 }
 0x54e   : > { %v1062_v23 = vadd.f32 1e-05, %v1060_v22  ;;  %v1057_v33 = vmul.f32 %v968_v24, %v968_v24  ;;  %v1068_v47 = vsub.f32 %v1810_v36, %v968_v24  ;;  %v1069_v48 = vsub.f32 %v1812_v38, %v968_v24 }
 0x54f   : > { %v1095_v39 = vpop.permute.xlu1 %1094 }
 0x550   : > { %1467 = vrsqrt.f32 %v1062_v23 }
 0x555   : > { %v1079_v31 = vpop.permute.xlu0 %1078 }
 0x55a   : > { %v1468_v29 = vpop.eup %1467 }
 0x55b   : > { %v1070_v32 = vmul.f32 %v1468_v29, %v1066_v26  ;;  %v1071_v34 = vmul.f32 %v1468_v29, %v1067_v27 }
 0x55d   : > { %v1086_v37 = vmul.f32 %v1079_v31, %v1070_v32  ;;  %v1087_v40 = vmul.f32 %v1079_v31, %v1071_v34 }
 0x55f   : > { %v1102_v41 = vadd.f32 %v1095_v39, %v1086_v37  ;;  %v1103_v42 = vadd.f32 %v1095_v39, %v1087_v40 }
 0x561   : > { %1122 = vrot.lane.b32.xlu0 %v1102_v41, %s1482_s27  ;;  %1106 = vrot.lane.b32.xlu1 %v1102_v41, %s1483_s28  ;;  %v1872_v63 = vmul.f32 %v1103_v42, %v1738_v30  ;;  %v1878_v38 = vmul.f32 %v1102_v41, %v1754_v45 }
 0x565   : > { %1126 = vrot.lane.b32.xlu0 %v1103_v42, %s1482_s27  ;;  %1110 = vrot.lane.b32.xlu1 %v1103_v42, %s1483_s28 }
 0x569   : > { %1138 = vrot.lane.b32.xlu0 %v1102_v41, %s1484_s29 }
 0x56d   : > { %1142 = vrot.lane.b32.xlu0 %v1103_v42, %s1484_s29 }
 0x571   : > { %1154 = vrot.lane.b32.xlu0 %v1102_v41, %s1485_s30 }
 0x575   : > { %1158 = vrot.lane.b32.xlu0 %v1103_v42, %s1485_s30 }
 0x579   : > { %1174 = vrot.lane.b32.xlu0 %v1102_v41, %s1486_s12 }
 0x57d   : > { %1178 = vrot.lane.b32.xlu0 %v1103_v42, %s1486_s12 }
 0x580   : > { %v1055_v35 = vpop.xlane.xlu1 %1054 }
 0x581   : > { %v1059_v43 = vsub.f32 %v1055_v35, %v1057_v33  ;;  %1190 = vrot.lane.b32.xlu0 %v1102_v41, %s1487_s13 }
 0x583   : > { %v1061_v44 = vmax.f32 %v1059_v43, 0.0 }
 0x584   : > { %v1100_v59 = vpop.permute.xlu1 %1099 }
 0x585   : > { %v1063_v46 = vadd.f32 1e-05, %v1061_v44  ;;  %1194 = vrot.lane.b32.xlu0 %v1103_v42, %s1487_s13 }
 0x587   : > { %1469 = vrsqrt.f32 %v1063_v46 }
 0x589   : > { %1206 = vrot.lane.b32.xlu0 %v1102_v41, %s1488_s14 }
 0x58d   : > { %1210 = vrot.lane.b32.xlu0 %v1103_v42, %s1488_s14 }
 0x591   : > { %v1470_v49 = vpop.eup %1469  ;;  %1222 = vrot.lane.b32.xlu0 %v1102_v41, %s1489_s15 }
 0x592   : > { %v1072_v52 = vmul.f32 %v1470_v49, %v1068_v47  ;;  %v1073_v55 = vmul.f32 %v1470_v49, %v1069_v48 }
 0x594   : > { %v1088_v58 = vmul.f32 %v1084_v25, %v1072_v52  ;;  %v1089_v51 = vmul.f32 %v1084_v25, %v1073_v55 }
 0x595   : > { %1226 = vrot.lane.b32.xlu0 %v1103_v42, %s1489_s15 }
 0x596   : > { %v1104_v61 = vadd.f32 %v1100_v59, %v1088_v58  ;;  %v1105_v62 = vadd.f32 %v1100_v59, %v1089_v51 }
 0x598   : > { %1108 = vrot.lane.b32.xlu1 %v1104_v61, %s1483_s28  ;;  %v1875_v36 = vmul.f32 %v1105_v62, %v1738_v30  ;;  %v1881_v1 = vmul.f32 %v1104_v61, %v1754_v45  ;;  %v1464_v30 = vld [vmem:[%s2028_s10 + $0x4] ss:$8 sps:$4 sm:$0xff]  }
 0x599   : > { %1398 = vmatprep.mubr.msk.bf16.mxu1 %vm879_vm13, %v1464_v30 }
 0x59a   : > { %v1247_v2 = vpack.c.bf16 %v1875_v36, %v1872_v63  ;;  %v1246_v50 = vpack.c.bf16 %v1881_v1, %v1878_v38 }
 0x59c   : > { %1112 = vrot.lane.b32.xlu1 %v1105_v62, %s1483_s28 }
 0x5a0   : > { %1124 = vrot.lane.b32.xlu1 %v1104_v61, %s1482_s27 }
 0x5a4   : > { %1128 = vrot.lane.b32.xlu1 %v1105_v62, %s1482_s27 }
 0x5a8   : > { %1140 = vrot.lane.b32.xlu1 %v1104_v61, %s1484_s29 }
 0x5ac   : > { %1144 = vrot.lane.b32.xlu1 %v1105_v62, %s1484_s29 }
 0x5b0   : > { %1156 = vrot.lane.b32.xlu1 %v1104_v61, %s1485_s30 }
 0x5b4   : > { %1160 = vrot.lane.b32.xlu1 %v1105_v62, %s1485_s30 }
 0x5b8   : > { %1176 = vrot.lane.b32.xlu1 %v1104_v61, %s1486_s12 }
 0x5bc   : > { %1180 = vrot.lane.b32.xlu1 %v1105_v62, %s1486_s12  ;;  %s1401_s12 = sshll.u32 %s2031_s18, 5 }
 0x5c0   : > { %1192 = vrot.lane.b32.xlu1 %v1104_v61, %s1487_s13 }
 0x5c4   : > { %1196 = vrot.lane.b32.xlu1 %v1105_v62, %s1487_s13 }
 0x5c8   : > { %1208 = vrot.lane.b32.xlu1 %v1104_v61, %s1488_s14 }
 0x5cc   : > { %1212 = vrot.lane.b32.xlu1 %v1105_v62, %s1488_s14 }
 0x5d0   : > { %1224 = vrot.lane.b32.xlu1 %v1104_v61, %s1489_s15 }
 0x5d3   : > { %v1123_v45 = vpop.permute.xlu0 %1122  ;;  %v1107_v0 = vpop.permute.xlu1 %1106 }
 0x5d4   : > { %1228 = vrot.lane.b32.xlu1 %v1105_v62, %s1489_s15  ;;  %s383_s15 = scalar_lea.vmem %s2029_s11, %s1401_s12 }
 0x5d7   : > { %v1127_v3 = vpop.permute.xlu0 %1126  ;;  %v1111_v5 = vpop.permute.xlu1 %1110 }
 0x5d8   : > { %v1114_v20 = vsel %vm660_vm3, %v1107_v0, %v1111_v5  ;;  %v1116_v21 = vsel %vm660_vm3, %v1111_v5, %v1107_v0  ;;  %v1130_v39 = vsel %vm677_vm5, %v1123_v45, %v1127_v3  ;;  %v1132_v40 = vsel %vm677_vm5, %v1127_v3, %v1123_v45 }
 0x5d9   : > { %v1118_v25 = vmul.f32 %v1116_v21, %v1696_v8  ;;  %v1119_v26 = vmul.f32 %v1114_v20, %v1698_v10  ;;  %v1135_v33 = vmul.f32 %v1130_v39, %v1704_v12 }
 0x5db   : > { %v1139_v4 = vpop.permute.xlu0 %1138 }
 0x5df   : > { %v1143_v14 = vpop.permute.xlu0 %1142 }
 0x5e0   : > { %v1146_v49 = vsel %vm694_vm7, %v1139_v4, %v1143_v14  ;;  %v1148_v52 = vsel %vm694_vm7, %v1143_v14, %v1139_v4 }
 0x5e1   : > { %v1151_v59 = vmul.f32 %v1146_v49, %v1719_v19 }
 0x5e3   : > { %v1155_v17 = vpop.permute.xlu0 %1154 }
 0x5e7   : > { %v1159_v31 = vpop.permute.xlu0 %1158 }
 0x5e8   : > { %v1162_v4 = vsel %vm711_vm4, %v1155_v17, %v1159_v31  ;;  %v1164_v5 = vsel %vm711_vm4, %v1159_v31, %v1155_v17 }
 0x5e9   : > { %v1167_v20 = vmul.f32 %v1162_v4, %v1706_v13 }
 0x5eb   : > { %v1175_v35 = vpop.permute.xlu0 %1174 }
 0x5ef   : > { %v1179_v55 = vpop.permute.xlu0 %1178 }
 0x5f3   : > { %v1191_v0 = vpop.permute.xlu0 %1190 }
 0x60a   : > { %v1109_v15 = vpop.permute.xlu1 %1108 }
 0x60e   : > { %v1113_v22 = vpop.permute.xlu1 %1112 }
 0x60f   : > { %v1115_v23 = vsel %vm660_vm3, %v1109_v15, %v1113_v22  ;;  %v1117_v24 = vsel %vm660_vm3, %v1113_v22, %v1109_v15 }
 0x610   : > { %v1120_v27 = vmul.f32 %v1117_v24, %v1696_v8  ;;  %v1121_v29 = vmul.f32 %v1115_v23, %v1698_v10  ;;  %v1134_v10 = vmul.f32 %v1132_v40, %v1702_v11  ;;  %v1195_v23 = vpop.permute.xlu0 %1194 }
 0x611   : > { %v1198_v40 = vsel %vm755_vm8, %v1191_v0, %v1195_v23 }
 0x612   : > { %v1238_v32 = vpack.c.bf16 %v1120_v27, %v1118_v25  ;;  %v1125_v34 = vpop.permute.xlu1 %1124  ;;  %v1239_v37 = vpack.c.bf16 %v1121_v29, %v1119_v26  ;;  %v1182_v26 = vsel %vm738_vm6, %v1175_v35, %v1179_v55  ;;  %v1184_v27 = vsel %vm738_vm6, %v1179_v55, %v1175_v35 }
 0x613   : > { %v1186_v31 = vmul.f32 %v1182_v26, %v1734_v28  ;;  %v1202_v38 = vmul.f32 %v1198_v40, %v1761_v53 }
 0x614   : > { %1270 = vmatprep.subr.bf16.mxu1 %v1239_v37 }
 0x615   : > { %1271 = vmatpush1.bf16.msra.mxu1 %v1238_v32  ;;  %v1187_v32 = vmul.f32 %v1184_v27, %v1713_v16 }
 0x616   : > { %v1129_v41 = vpop.permute.xlu1 %1128 }
 0x617   : > { %v1131_v42 = vsel %vm677_vm5, %v1125_v34, %v1129_v41  ;;  %v1133_v8 = vsel %vm677_vm5, %v1129_v41, %v1125_v34  ;;  %v1207_v34 = vpop.permute.xlu0 %1206  ;;  %v1200_v41 = vsel %vm755_vm8, %v1195_v23, %v1191_v0 }
 0x618   : > { %v1136_v43 = vmul.f32 %v1133_v8, %v1702_v11  ;;  %v1137_v44 = vmul.f32 %v1131_v42, %v1704_v12  ;;  %v1150_v12 = vmul.f32 %v1148_v52, %v1717_v18  ;;  %v1203_v1 = vmul.f32 %v1200_v41, %v1763_v54 }
 0x61a   : > { %v1240_v46 = vpack.c.bf16 %v1136_v43, %v1134_v10  ;;  %v1141_v47 = vpop.permute.xlu1 %1140  ;;  %v1241_v48 = vpack.c.bf16 %v1137_v44, %v1135_v33 }
 0x61b   : > { %v1211_v42 = vpop.permute.xlu0 %1210 }
 0x61c   : > { %1272 = vmatprep.subr.bf16.mxu1 %v1241_v48 }
 0x61d   : > { %1273 = vmatpush1.bf16.msra.mxu1 %v1240_v46  ;;  %v1214_v46 = vsel %vm772_vm9, %v1207_v34, %v1211_v42 }
 0x61e   : > { %v1145_v58 = vpop.permute.xlu1 %1144 }
 0x61f   : > { %v1147_v51 = vsel %vm694_vm7, %v1141_v47, %v1145_v58  ;;  %v1149_v11 = vsel %vm694_vm7, %v1145_v58, %v1141_v47  ;;  %v1223_v44 = vpop.permute.xlu0 %1222  ;;  %v1216_v47 = vsel %vm772_vm9, %v1211_v42, %v1207_v34 }
 0x620   : > { %v1152_v61 = vmul.f32 %v1149_v11, %v1717_v18  ;;  %v1153_v62 = vmul.f32 %v1147_v51, %v1719_v19  ;;  %v1166_v19 = vmul.f32 %v1164_v5, %v1692_v6  ;;  %v1219_v52 = vmul.f32 %v1216_v47, %v1769_v57 }
 0x622   : > { %v1242_v30 = vpack.c.bf16 %v1152_v61, %v1150_v12  ;;  %v1157_v45 = vpop.permute.xlu1 %1156  ;;  %v1243_v3 = vpack.c.bf16 %v1153_v62, %v1151_v59 }
 0x623   : > { %v1227_v51 = vpop.permute.xlu0 %1226 }
 0x624   : > { %1274 = vmatprep.subr.bf16.mxu1 %v1243_v3  ;;  %v1230_v61 = vsel %vm789_vm10, %v1223_v44, %v1227_v51  ;;  %v1232_v62 = vsel %vm789_vm10, %v1227_v51, %v1223_v44 }
 0x625   : > { %1275 = vmatpush1.bf16.msra.mxu1 %v1242_v30  ;;  %v1235_v3 = vmul.f32 %v1794_v9, %v1232_v62 }
 0x626   : > { %v1161_v14 = vpop.permute.xlu1 %1160 }
 0x627   : > { %v1163_v15 = vsel %vm711_vm4, %v1157_v45, %v1161_v14  ;;  %v1165_v18 = vsel %vm711_vm4, %v1161_v14, %v1157_v45 }
 0x628   : > { %v1168_v21 = vmul.f32 %v1165_v18, %v1692_v6  ;;  %v1169_v22 = vmul.f32 %v1163_v15, %v1706_v13  ;;  %v1462_v15 = vld [vmem:[%s2028_s10] ss:$8 sps:$4 sm:$0xff]  }
 0x62a   : > { %v1244_v24 = vpack.c.bf16 %v1168_v21, %v1166_v19  ;;  %v1177_v25 = vpop.permute.xlu1 %1176  ;;  %v1245_v17 = vpack.c.bf16 %v1169_v22, %v1167_v20 }
 0x62c   : > { %1276 = vmatprep.subr.bf16.mxu1 %v1245_v17 }
 0x62d   : > { %1277 = vmatpush1.bf16.msra.mxu1 %v1244_v24 }
 0x62e   : > { %1278 = vmatprep.subr.bf16.mxu1 %v1247_v2  ;;  %v1181_v29 = vpop.permute.xlu1 %1180 }
 0x62f   : > { %v1183_v6 = vsel %vm738_vm6, %v1177_v25, %v1181_v29  ;;  %v1185_v13 = vsel %vm738_vm6, %v1181_v29, %v1177_v25 }
 0x630   : > { %v1188_v37 = vmul.f32 %v1183_v6, %v1734_v28  ;;  %v1189_v39 = vmul.f32 %v1185_v13, %v1713_v16 }
 0x631   : > { %1279 = vmatpush1.bf16.msra.mxu1 %v1246_v50 }
 0x632   : > { %v1248_v63 = vpack.c.bf16 %v1188_v37, %v1186_v31  ;;  %v1193_v36 = vpop.permute.xlu1 %1192  ;;  %v1249_v2 = vpack.c.bf16 %v1189_v39, %v1187_v32 }
 0x634   : > { %1280 = vmatprep.subr.bf16.mxu1 %v1249_v2 }
 0x635   : > { %1281 = vmatpush1.bf16.msra.mxu1 %v1248_v63 }
 0x636   : > { %v1197_v8 = vpop.permute.xlu1 %1196 }
 0x637   : > { %v1199_v16 = vsel %vm755_vm8, %v1193_v36, %v1197_v8  ;;  %v1201_v28 = vsel %vm755_vm8, %v1197_v8, %v1193_v36 }
 0x638   : > { %v1204_v50 = vmul.f32 %v1199_v16, %v1761_v53  ;;  %v1205_v10 = vmul.f32 %v1201_v28, %v1763_v54  ;;  %v1218_v54 = vmul.f32 %v1214_v46, %v1767_v56 }
 0x63a   : > { %v1250_v33 = vpack.c.bf16 %v1204_v50, %v1202_v38  ;;  %v1209_v35 = vpop.permute.xlu1 %1208  ;;  %v1251_v43 = vpack.c.bf16 %v1205_v10, %v1203_v1 }
 0x63c   : > { %1282 = vmatprep.subr.bf16.mxu1 %v1251_v43 }
 0x63d   : > { %1283 = vmatpush1.bf16.msra.mxu1 %v1250_v33 }
 0x63e   : > { %v1213_v48 = vpop.permute.xlu1 %1212 }
 0x63f   : > { %v1215_v49 = vsel %vm772_vm9, %v1209_v35, %v1213_v48  ;;  %v1217_v53 = vsel %vm772_vm9, %v1213_v48, %v1209_v35 }
 0x640   : > { %v1220_v55 = vmul.f32 %v1215_v49, %v1767_v56  ;;  %v1221_v58 = vmul.f32 %v1217_v53, %v1769_v57  ;;  %v1234_v57 = vmul.f32 %v1789_v7, %v1230_v61 }
 0x642   : > { %v1252_v11 = vpack.c.bf16 %v1220_v55, %v1218_v54  ;;  %v1225_v12 = vpop.permute.xlu1 %1224  ;;  %v1253_v59 = vpack.c.bf16 %v1221_v58, %v1219_v52 }
 0x644   : > { %1284 = vmatprep.subr.bf16.mxu1 %v1253_v59 }
 0x645   : > { %1285 = vmatpush1.bf16.msra.mxu1 %v1252_v11 }
 0x646   : > { %v1229_v30 = vpop.permute.xlu1 %1228 }
 0x647   : > { %v1231_v45 = vsel %vm789_vm10, %v1225_v12, %v1229_v30  ;;  %v1233_v56 = vsel %vm789_vm10, %v1229_v30, %v1225_v12 }
 0x648   : > { %v1236_v0 = vmul.f32 %v1789_v7, %v1231_v45  ;;  %v1237_v4 = vmul.f32 %v1794_v9, %v1233_v56 }
 0x64a   : > { %v1254_v5 = vpack.c.bf16 %v1236_v0, %v1234_v57  ;;  %v1255_v14 = vpack.c.bf16 %v1237_v4, %v1235_v3 }
 0x64c   : > { %1286 = vmatprep.subr.bf16.mxu1 %v1255_v14 }
 0x64d   : > { %1287 = vmatpush1.bf16.msra.mxu1 %v1254_v5 }
 0x650   : > { %1303 = vmatmul.mubr.bf16.vlgmr.msra.gmra.mrb[8].mxu1 %v1462_v15 }
 0x723   : > { %v1304_v60 = vpop.f32.mrb[8].mxu1 }
 0x724   : > { %v1313_v18 = vmax.f32 %v1304_v60, 0.0  ;;  %v1306_v19 = vpop.f32.mrb[9].mxu1 }
 0x725   : > { %v1314_v7 = vmax.f32 %v1306_v19, 0.0  ;;  %v1308_v20 = vpop.f32.mrb[10].mxu1 }
 0x726   : > { %1317 = vst [vmem:[%s383_s15] sm:$0xff] %v1313_v18  ;;  %v1315_v9 = vmax.f32 %v1308_v20, 0.0  ;;  %v1310_v21 = vpop.f32.mrb[11].mxu1 }
 0x727   : > { %1318 = vst [vmem:[%s383_s15 + $0x8] sm:$0xff] %v1314_v7  ;;  %v1316_v22 = vmax.f32 %v1310_v21, 0.0 }
 0x728   : > { %1319 = vst [vmem:[%s383_s15 + $0x10] sm:$0xff] %v1315_v9 }
 0x729   : > { %1320 = vst [vmem:[%s383_s15 + $0x18] sm:$0xff] %v1316_v22 }
 0x72a PF: > { %s21_s17 = sadd.s32 1, %s1477_s17  }
 0x72b   : > { %p18_p4 = scmp.ge.s32.totalorder %s21_s17, 4  }
 0x72d   :  { %20 = sbr.rel (!%p18_p4) target bundleno = 1 (0x1), region = 94 }

</bundles_post_ra>
